<compile_context>
chip_gen: v5e
topology: v5e:2x2
jax: 0.10.0
libtpu: 0.0.40
codegen_flags: <defaults>
</compile_context>

<pallas_src>
import jax
import jax.numpy as jnp
from jax.experimental import pallas as pl
from jax.experimental.pallas import tpu as pltpu

_LANE = 128


def _row_loss(x1, x2):
    """Per-row loss: 2 - 2 * <x1, x2> / (max(|x1|, eps) * max(|x2|, eps))."""
    x1 = x1.astype(jnp.float32)
    x2 = x2.astype(jnp.float32)
    s1 = jnp.sum(x1 * x1, axis=-1)
    s2 = jnp.sum(x2 * x2, axis=-1)
    dot = jnp.sum(x1 * x2, axis=-1)
    # F.normalize clamps the *norm* at eps=1e-12 -> clamp squared norms at eps^2.
    eps_sq = jnp.float32(1e-24)
    # Two rsqrt (EUP slot, essentially free here) instead of sqrt+divide.
    inv = jax.lax.rsqrt(jnp.maximum(s1, eps_sq)) * jax.lax.rsqrt(jnp.maximum(s2, eps_sq))
    return 2.0 - 2.0 * dot * inv


def _make_byol_kernel(nch, rc):
    """Kernel for one (tm, D) streamed block -> one (1, nch, rc) output block."""

    def kernel(x1_ref, x2_ref, o_ref):
        if nch == 1:
            # Small / single-chunk block: plain full loads + one lane-dense store.
            loss = _row_loss(x1_ref[...], x2_ref[...])
            o_ref[...] = loss.reshape(o_ref.shape).astype(o_ref.dtype)
        else:
            # Large block: process rc-row chunks so f32 temporaries stay small.
            def body(c, carry):
                r0 = pl.multiple_of(c * rc, rc)
                loss = _row_loss(x1_ref[pl.ds(r0, rc), :], x2_ref[pl.ds(r0, rc), :])
                o_ref[:, pl.ds(c, 1), :] = loss.reshape(1, 1, rc).astype(o_ref.dtype)
                return carry

            jax.lax.fori_loop(0, nch, body, 0, unroll=(nch <= 8))

    return kernel


def _vmem_plan():
    """(vmem_limit_bytes, block_budget_bytes, target_hbm_read_per_step)."""
    cap = None
    try:
        info = pltpu.get_tpu_info()
        cap = int(getattr(info, "vmem_capacity_bytes", 0)) or None
    except Exception:
        cap = None
    if cap is not None and cap <= (64 << 20):
        # v7x-class: 64 MiB VMEM per TC -> cap scoped limit well below physical;
        # ~2x HBM BW -> bigger per-step reads so the ~0.35 us step overhead hides.
        return 40 << 20, 30 << 20, 16 << 20
    if cap is not None:
        # v5e / v6e: 128 MiB physical VMEM -> generous scoped limit, bigger tiles.
        return 64 << 20, 48 << 20, 8 << 20
    # Unknown backend: conservative numbers that are safe on every generation.
    return 40 << 20, 30 << 20, 8 << 20


def _plan_tiles(M, D, itemsize1, itemsize2, block_budget, target_read):
    """Pick (rows_per_step tm, grid, rows_per_chunk rc, chunks_per_step nch)."""
    sub = max(8, 32 // min(itemsize1, itemsize2))     # sublane packing multiple
    in_row = D * (itemsize1 + itemsize2)              # HBM bytes read per row

    # Rows per inner chunk: bounds the f32 working set (~ a few MiB) per chunk.
    rc = min(512, max(_LANE, ((2 << 20) // max(4 * D, 1)) // _LANE * _LANE))
    chunk_work = rc * (3 * 4 * D + 2048)              # f32 temps + column vreg pad
    row_vmem = 2 * in_row + 2 * 4                     # double-buffered in + out row

    avail = max(block_budget - chunk_work, row_vmem * sub)
    tm = min(avail // row_vmem, max(_LANE, target_read // max(in_row, 1)))

    # >=8 grid steps when there is enough work: >=4 pipelined steps per v7x core,
    # full double-buffer overlap on single-TC v5e/v6e.
    if M >= 8 * _LANE:
        tm = min(tm, M // 8)

    if tm >= M:
        return M, 1, M, 1                             # single full-extent block

    if tm >= 2 * rc:
        tm = (tm // rc) * rc                          # multiple of the chunk size
    elif tm >= _LANE:
        tm = (tm // _LANE) * _LANE                    # lane-dense single chunk
        rc = tm
    else:
        # Huge-D fallback: tiny sublane tiles (narrow, masked output stores).
        # TODO(synk): add an "arbitrary" grid axis over D with partial-sum
        # accumulators + pl.when finalize instead of degrading the row tile.
        tm = min(M, max(sub, (tm // sub) * sub))
        rc = tm

    grid = pl.cdiv(M, tm)
    return tm, grid, rc, tm // rc


def byol_loss(x_1, x_2):
    """BYOL loss: 2 - 2 * <normalize(x1), normalize(x2)> along the last dim."""
    assert x_1.shape == x_2.shape, "BYOL loss requires matching shapes"
    batch_shape = x_1.shape[:-1]
    D = x_1.shape[-1]

    # Flatten leading dims; no padding copy (mem-bound kernel — padding would
    # add an extra full HBM pass over both inputs).
    x1f = x_1.reshape(-1, D)
    x2f = x_2.reshape(-1, D)
    M = x1f.shape[0]

    it1 = jnp.dtype(x1f.dtype).itemsize
    it2 = jnp.dtype(x2f.dtype).itemsize
    vmem_limit, block_budget, target_read = _vmem_plan()
    tm, grid, rc, nch = _plan_tiles(M, D, it1, it2, block_budget, target_read)

    out = pl.pallas_call(
        _make_byol_kernel(nch, rc),
        out_shape=jax.ShapeDtypeStruct((grid, nch, rc), jnp.float32),
        grid_spec=pltpu.PrefetchScalarGridSpec(
            num_scalar_prefetch=0,
            grid=(grid,),
            in_specs=[
                pl.BlockSpec((tm, D), lambda i: (i, 0)),
                pl.BlockSpec((tm, D), lambda i: (i, 0)),
            ],
            # Lane-dense output block: minor dim rc always equals the full
            # array extent (unmasked stores when rc is a multiple of 128).
            out_specs=pl.BlockSpec((1, nch, rc), lambda i: (i, 0, 0)),
        ),
        compiler_params=pltpu.CompilerParams(
            dimension_semantics=("parallel",),
            vmem_limit_bytes=int(vmem_limit),
        ),
    )(x1f, x2f)

    # The padded tail of the last block holds garbage reductions; slice it off.
    return out.reshape(-1)[:M].reshape(batch_shape)


if __name__ == "__main__":
    key = jax.random.PRNGKey(0)

    def ref(a, b):
        a = a.astype(jnp.float32)
        b = b.astype(jnp.float32)
        an = a / jnp.maximum(jnp.linalg.norm(a, axis=-1, keepdims=True), 1e-12)
        bn = b / jnp.maximum(jnp.linalg.norm(b, axis=-1, keepdims=True), 1e-12)
        return 2.0 - 2.0 * jnp.sum(an * bn, axis=-1)

    k1, k2, k3, k4, k5, k6 = jax.random.split(key, 6)

    # Case 1: multi-dim batch (2, 8, 32) -> single full-extent block.
    x_1 = jax.random.normal(k1, (2, 8, 32), dtype=jnp.float32)
    x_2 = jax.random.normal(k2, (2, 8, 32), dtype=jnp.float32)
    loss = byol_loss(x_1, x_2)
    jax.block_until_ready(loss)
    assert loss.shape == (2, 8)
    assert jnp.allclose(loss, ref(x_1, x_2), atol=1e-5, rtol=1e-5)

    # Case 2: tiny ragged row count (12 rows, 16 features) -> single block.
    y_1 = jax.random.normal(k3, (12, 16), dtype=jnp.float32)
    y_2 = jax.random.normal(k4, (12, 16), dtype=jnp.float32)
    loss2 = byol_loss(y_1, y_2)
    jax.block_until_ready(loss2)
    assert loss2.shape == (12,)
    assert jnp.allclose(loss2, ref(y_1, y_2), atol=1e-5, rtol=1e-5)

    # Case 3: multi-step grid with a ragged last block and the multi-chunk
    # lane-dense path (8256 rows, D=64 -> tm=1024, rc=512, nch=2, grid=9).
    z_1 = jax.random.normal(k5, (8256, 64), dtype=jnp.float32)
    z_2 = jax.random.normal(k6, (8256, 64), dtype=jnp.float32)
    loss3 = byol_loss(z_1, z_2)
    jax.block_until_ready(loss3)
    assert loss3.shape == (8256,)
    assert jnp.allclose(loss3, ref(z_1, z_2), atol=1e-4, rtol=1e-4)

    print("KERNEL_OK")
</pallas_src>

<mosaic_0001>
module attributes {stable_mosaic.version = 11 : i64} {
  func.func @kernel(%arg0: i32, %arg1: memref<16x32xf32, #tpu.memory_space<vmem>>, %arg2: memref<16x32xf32, #tpu.memory_space<vmem>>, %arg3: memref<1x1x16xf32, #tpu.memory_space<vmem>>) attributes {dimension_semantics = [#tpu.dimension_semantics<parallel>], iteration_bounds = array<i64: 1>, scalar_prefetch = 0 : i64, scratch_operands = 0 : i64, tpu.core_type = #tpu.core_type<tc>, window_params = [{transform_indices = @transform_0, window_bounds = array<i64: 16, 32>}, {transform_indices = @transform_1, window_bounds = array<i64: 16, 32>}, {transform_indices = @transform_2, window_bounds = array<i64: 1, 1, 16>}]} {
    %c0 = arith.constant 0 : index
    %c0_0 = arith.constant 0 : index
    %0 = vector.load %arg1[%c0, %c0_0] : memref<16x32xf32, #tpu.memory_space<vmem>>, vector<16x32xf32>
    %c0_1 = arith.constant 0 : index
    %c0_2 = arith.constant 0 : index
    %1 = vector.load %arg2[%c0_1, %c0_2] : memref<16x32xf32, #tpu.memory_space<vmem>>, vector<16x32xf32>
    %2 = arith.mulf %0, %0 : vector<16x32xf32>
    %cst = arith.constant dense<0.000000e+00> : vector<16xf32>
    %3 = vector.multi_reduction <add>, %2, %cst [1] : vector<16x32xf32> to vector<16xf32>
    %4 = arith.mulf %1, %1 : vector<16x32xf32>
    %cst_3 = arith.constant dense<0.000000e+00> : vector<16xf32>
    %5 = vector.multi_reduction <add>, %4, %cst_3 [1] : vector<16x32xf32> to vector<16xf32>
    %6 = arith.mulf %0, %1 : vector<16x32xf32>
    %cst_4 = arith.constant dense<0.000000e+00> : vector<16xf32>
    %7 = vector.multi_reduction <add>, %6, %cst_4 [1] : vector<16x32xf32> to vector<16xf32>
    %cst_5 = arith.constant 1.000000e-24 : f32
    %8 = vector.broadcast %cst_5 : f32 to vector<16xf32>
    %9 = arith.maximumf %3, %8 : vector<16xf32>
    %10 = math.rsqrt %9 : vector<16xf32>
    %cst_6 = arith.constant 1.000000e-24 : f32
    %11 = vector.broadcast %cst_6 : f32 to vector<16xf32>
    %12 = arith.maximumf %5, %11 : vector<16xf32>
    %13 = math.rsqrt %12 : vector<16xf32>
    %14 = arith.mulf %10, %13 : vector<16xf32>
    %cst_7 = arith.constant 2.000000e+00 : f32
    %15 = vector.broadcast %cst_7 : f32 to vector<16xf32>
    %16 = arith.mulf %15, %7 : vector<16xf32>
    %17 = arith.mulf %16, %14 : vector<16xf32>
    %cst_8 = arith.constant 2.000000e+00 : f32
    %18 = vector.broadcast %cst_8 : f32 to vector<16xf32>
    %19 = arith.subf %18, %17 : vector<16xf32>
    %20 = vector.shape_cast %19 : vector<16xf32> to vector<1x1x16xf32>
    %c0_9 = arith.constant 0 : index
    %c0_10 = arith.constant 0 : index
    %c0_11 = arith.constant 0 : index
    %21 = vector.load %arg3[%c0_9, %c0_10, %c0_11] : memref<1x1x16xf32, #tpu.memory_space<vmem>>, vector<1x1x16xf32>
    tpu.vector_store %arg3[%c0_9, %c0_10, %c0_11], %20 {strides = array<i32>} : memref<1x1x16xf32, #tpu.memory_space<vmem>>, vector<1x1x16xf32>,
    return
  }
  func.func @transform_0(%arg0: i32) -> (i32, i32) {
    %c0_i32 = arith.constant 0 : i32
    %c0_i32_0 = arith.constant 0 : i32
    return %arg0, %c0_i32 : i32, i32
  }
  func.func @transform_1(%arg0: i32) -> (i32, i32) {
    %c0_i32 = arith.constant 0 : i32
    %c0_i32_0 = arith.constant 0 : i32
    return %arg0, %c0_i32 : i32, i32
  }
  func.func @transform_2(%arg0: i32) -> (i32, i32, i32) {
    %c0_i32 = arith.constant 0 : i32
    %c0_i32_0 = arith.constant 0 : i32
    %c0_i32_1 = arith.constant 0 : i32
    return %arg0, %c0_i32, %c0_i32_0 : i32, i32, i32
  }
}

</mosaic_0001>

<bundles_post_ra>
// kernel: tpu_custom_call.1
= control target key start
LH: loop header
LB: loop body
LE: loop exit
PB: predicated region body
PF: predicated region fallthrough
CT: control target
= control target key end

     0   :  { %7 = vsyncpa [#allocation3], 0  ;;  %s281_s0 = inlined_call_operand.hbm [shape: f32[16,32], index: 0, kind: input, shape index: {}]   ;;  %s282_s1 = inlined_call_operand.hbm [shape: f32[16,32], index: 1, kind: input, shape index: {}]   ;;  %s283_s2 = inlined_call_operand.hbm [shape: f32[1,1,16], index: 2, kind: output, shape index: {}]  }
   0x1   :  { %8 = vsyncpa [#allocation6], 0 }
   0x2   :  { %9 = vsyncpa [#allocation4], 0  ;;  %s14_s11 = sshll.u32 %s281_s0, 4  ;;  %s246_s12 = smov [#allocation2]   ;;  %s15_s11 = int_to_ptr.hbm [resolvable:$true] %s14_s11 }
   0x3   :  { %s16_s13 = sshll.u32 %s246_s12, 4  ;;  %s27_s16 = sshll.u32 %s282_s1, 4  ;;  %s17_s13 = int_to_ptr.vmem [resolvable:$true] %s16_s13  ;;  %s28_s16 = int_to_ptr.hbm [resolvable:$true] %s27_s16 }
   0x4   :  { %s247_s17 = smov 128   ;;  %s248_s18 = smov 8  }
   0x5   :  { %22 = dma.hbm_to_vmem [thread:$0]  %s15_s11, 256, %s17_s13, [#allocation3], %s247_s17, %s247_s17, %s248_s18  }
   0x6   :  { %s249_s19 = smov [#allocation5]  }
   0x7   :  { %s29_s20 = sshll.u32 %s249_s19, 4  ;;  %s30_s20 = int_to_ptr.vmem [resolvable:$true] %s29_s20 }
   0x8   :  { %35 = dma.hbm_to_vmem [thread:$0]  %s28_s16, 256, %s30_s20, [#allocation6], %s247_s17, %s247_s17, %s248_s18  }
   0x9   :  { %240 = dma.done.wait [#allocation3], 256  }
   0xa   :  { %241 = vsyncadd [#allocation3], 4294967040 }
   0xb   :  { %242 = dma.done.wait [#allocation6], 256  }
   0xc   :  { %243 = vsyncadd [#allocation6], 4294967040  ;;  %v46_v0 = vld [vmem:[#allocation5] sm:$0xff]  ;;  %vm50_vm0 = vcmask 261120   ;;  %v44_v1 = vld [vmem:[#allocation2] sm:$0xff]  ;;  %v127_v52 = vlaneseq  ;;  %s250_s0 = smov [#allocation7]  }
   0xd   :  { %v57_v2 = vmul.f32 %v46_v0, %v46_v0  ;;  %v48_v3 = vmul.f32 %v44_v1, %v44_v1  ;;  %v65_v4 = vmul.f32 %v46_v0, %v44_v1  ;;  %v47_v5 = vld [vmem:[#allocation5 + $0x8] sm:$0xff]  ;;  %v45_v6 = vld [vmem:[#allocation2 + $0x8] sm:$0xff]  ;;  %s142_s1 = sshll.u32 %s250_s0, 4  ;;  %s144_s23 = sshll.u32 %s283_s2, 4  ;;  %vm132_vm13 = vcmask 130112   ;;  %s143_s1 = int_to_ptr.vmem [resolvable:$true] %s142_s1  ;;  %s145_s23 = int_to_ptr.hbm [resolvable:$true] %s144_s23 }
   0xe   :  { %v58_v10 = vmul.f32 %v47_v5, %v47_v5  ;;  %v49_v11 = vmul.f32 %v45_v6, %v45_v6  ;;  %v66_v12 = vmul.f32 %v47_v5, %v45_v6  ;;  %v128_v59 = vand.u32 127, %v127_v52 }
   0xf   :  { %v59_v7 = vsel %vm50_vm0, %v57_v2, 0.0  ;;  %v51_v8 = vsel %vm50_vm0, %v48_v3, 0.0  ;;  %v67_v9 = vsel %vm50_vm0, %v65_v4, 0.0  ;;  %vm135_vm14 = vcmask 122880  }
  0x10   :  { %60 = vadd.xlane.f32.xlu1 %v59_v7  ;;  %52 = vadd.xlane.f32.xlu0 %v51_v8  ;;  %v62_v13 = vsel %vm50_vm0, %v58_v10, 0.0  ;;  %v54_v14 = vsel %vm50_vm0, %v49_v11, 0.0  ;;  %v70_v15 = vsel %vm50_vm0, %v66_v12, 0.0  ;;  %v130_v62 = vadd.s32 4294967288, %v128_v59 }
  0x11   :  { %68 = vadd.xlane.f32.xlu2 %v67_v9 }
  0x18   :  { %63 = vadd.xlane.f32.xlu1 %v62_v13  ;;  %55 = vadd.xlane.f32.xlu0 %v54_v14 }
  0x19   :  { %71 = vadd.xlane.f32.xlu2 %v70_v15 }
  0x83   :  { %v61_v16 = vpop.xlane.xlu1 %60  ;;  %v53_v17 = vpop.xlane.xlu0 %52 }
  0x84   :  { %v95_v18 = vmax.f32 %v61_v16, 1e-24  ;;  %v73_v19 = vmax.f32 %v53_v17, 1e-24  ;;  %v69_v32 = vpop.xlane.xlu2 %68 }
  0x85   :  { %v119_v49 = vmul.f32 2.0, %v69_v32 }
  0x86   :  { %160 = vrsqrt.f32 %v95_v18  ;;  %vm103_vm3 = vweird.f32 %v95_v18  ;;  %vm81_vm5 = vweird.f32 %v73_v19 }
  0x87   :  { %162 = vrsqrt.f32 %v73_v19 }
  0x8b   :  { %v64_v20 = vpop.xlane.xlu1 %63  ;;  %v56_v21 = vpop.xlane.xlu0 %55 }
  0x8c   :  { %v161_v22 = vpop.eup %160  ;;  %v96_v23 = vmax.f32 %v64_v20, 1e-24  ;;  %v74_v24 = vmax.f32 %v56_v21, 1e-24  ;;  %v72_v51 = vpop.xlane.xlu2 %71 }
  0x8d   :  { %v163_v25 = vpop.eup %162  ;;  %v98_v26 = vmul.f32 %v161_v22, %v95_v18  ;;  %vm104_vm1 = vweird.f32 %v161_v22  ;;  %v120_v57 = vmul.f32 2.0, %v72_v51 }
  0x8e   :  { %v76_v27 = vmul.f32 %v163_v25, %v73_v19  ;;  %164 = vrsqrt.f32 %v96_v23  ;;  %vm82_vm2 = vweird.f32 %v163_v25  ;;  %vm105_vm4 = vmor %vm103_vm3, %vm104_vm1  ;;  %vm113_vm9 = vweird.f32 %v96_v23 }
  0x8f   :  { %v99_v28 = vmul.f32 %v161_v22, %v98_v26  ;;  %166 = vrsqrt.f32 %v74_v24  ;;  %vm83_vm6 = vmor %vm81_vm5, %vm82_vm2  ;;  %vm91_vm11 = vweird.f32 %v74_v24 }
  0x90   :  { %v77_v29 = vmul.f32 %v163_v25, %v76_v27 }
  0x91   :  { %v100_v30 = vmul.f32 0.5, %v99_v28 }
  0x92   :  { %v78_v31 = vmul.f32 0.5, %v77_v29 }
  0x93   :  { %v101_v33 = vsub.f32 1.5, %v100_v30 }
  0x94   :  { %v165_v34 = vpop.eup %164  ;;  %v79_v35 = vsub.f32 1.5, %v78_v31 }
  0x95   :  { %v167_v36 = vpop.eup %166  ;;  %v108_v37 = vmul.f32 %v165_v34, %v96_v23  ;;  %v102_v38 = vmul.f32 %v161_v22, %v101_v33  ;;  %vm114_vm7 = vweird.f32 %v165_v34 }
  0x96   :  { %v86_v39 = vmul.f32 %v167_v36, %v74_v24  ;;  %v80_v40 = vmul.f32 %v163_v25, %v79_v35  ;;  %vm92_vm8 = vweird.f32 %v167_v36  ;;  %vm115_vm10 = vmor %vm113_vm9, %vm114_vm7 }
  0x97   :  { %v109_v41 = vmul.f32 %v165_v34, %v108_v37  ;;  %v106_v43 = vsel %vm105_vm4, %v161_v22, %v102_v38  ;;  %vm93_vm12 = vmor %vm91_vm11, %vm92_vm8 }
  0x98   :  { %v87_v42 = vmul.f32 %v167_v36, %v86_v39  ;;  %v84_v44 = vsel %vm83_vm6, %v163_v25, %v80_v40 }
  0x99   :  { %v110_v45 = vmul.f32 0.5, %v109_v41  ;;  %v117_v48 = vmul.f32 %v106_v43, %v84_v44 }
  0x9a   :  { %v88_v46 = vmul.f32 0.5, %v87_v42 }
  0x9b   :  { %v111_v47 = vsub.f32 1.5, %v110_v45  ;;  %v121_v55 = vmul.f32 %v119_v49, %v117_v48 }
  0x9c   :  { %v89_v50 = vsub.f32 1.5, %v88_v46 }
  0x9d   :  { %v112_v53 = vmul.f32 %v165_v34, %v111_v47  ;;  %v123_v61 = vsub.f32 2.0, %v121_v55 }
  0x9e   :  { %v90_v54 = vmul.f32 %v167_v36, %v89_v50 }
  0x9f   :  { %v116_v56 = vsel %vm115_vm10, %v165_v34, %v112_v53  ;;  %v129_v1 = vperm.slane %v123_v61, %v128_v59 }
  0xa0   :  { %v94_v58 = vsel %vm93_vm12, %v167_v36, %v90_v54 }
  0xa1   :  { %v118_v60 = vmul.f32 %v116_v56, %v94_v58 }
  0xa3   :  { %v122_v63 = vmul.f32 %v120_v57, %v118_v60 }
  0xa5   :  { %v124_v0 = vsub.f32 2.0, %v122_v63 }
  0xa7   :  { %v131_v2 = vperm.slane %v124_v0, %v130_v62 }
  0xa9   :  { %v133_v3 = vsel %vm132_vm13, %v131_v2, %v129_v1 }
  0xaa   :  { %136 = vst.msk [vmem:[#allocation7] sm:$0x1] %vm135_vm14, %v133_v3 }
  0xab   :  { %147 = dma.vmem_to_hbm [thread:$0]  %s143_s1, 16, %s145_s23, [#allocation4]  }
  0xac   :  { %244 = dma.done.wait [#allocation4], 16  }
  0xad   :  { %245 = vsyncadd [#allocation4], 4294967280 }
  0xae   :  { %152 = vsyncpa [#allocation3], 1 }
  0xaf   :  { %153 = vsyncpa [#allocation6], 1 }
  0xb0   :  { %154 = vsyncpa [#allocation4], 1 }

</bundles_post_ra>
